<compile_context>
chip_gen: v6e
topology: v6e:2x2x1
jax: 0.10.0
libtpu: 0.0.40
codegen_flags: <defaults>
</compile_context>

<pallas_src>
import functools

import jax
import jax.numpy as jnp
from jax.experimental import pallas as pl
from jax.experimental.pallas import tpu as pltpu


def _round_up(x: int, m: int) -> int:
    return (x + m - 1) // m * m


def _vmem_capacity_bytes() -> int:
    # Guarded: fall back to the smallest per-TC VMEM (v7x, 64 MiB) if the query is
    # unavailable in this jax build.
    try:
        info_fn = getattr(pltpu, "get_tpu_info", None)
        if info_fn is not None:
            cap = int(info_fn().vmem_capacity_bytes)
            if cap > 0:
                return cap
    except Exception:
        pass
    return 64 << 20


def _pick_tm(rows: int) -> int:
    # 256-row LHS tiles feed the 256-wide MXU on v6e/v7x for prefill; small/decode
    # shapes use the smallest 16-aligned tile (bf16 sublane packing) to avoid padding.
    if rows >= 2048:
        return 256
    if rows >= 1024:
        return 128
    return max(16, _round_up(min(rows, 128), 16))


def _pick_tf(F: int, H: int, tm: int, w_itemsize: int, x_itemsize: int,
             vmem_budget: int) -> int:
    # Largest F tile whose double-buffered working set (w1 + w3 + w2 blocks, x tile,
    # f32 output + accumulator) fits the VMEM budget.
    cands = [c for c in (2048, 1536, 1024, 768, 512, 384, 256, 128) if F % c == 0]
    if not cands:
        return F
    fixed = 2 * tm * H * x_itemsize + 2 * tm * H * 4 + tm * H * 4
    for tf in cands:
        if fixed + 2 * 3 * tf * H * w_itemsize <= vmem_budget:
            return tf
    return cands[-1]


# ---------------------------------------------------------------------------
# Kernel 1: router gate matmul  (T_pad, H) x (E_pad, H) -> (T_pad, E_pad), f32 accum.
# Native-dtype inputs (bf16 stays bf16), expert dim padded to 128 lanes.
# ---------------------------------------------------------------------------
def _gate_kernel(x_ref, wg_ref, o_ref):
    o_ref[...] = jax.lax.dot_general(
        x_ref[...], wg_ref[...],
        dimension_numbers=(((1,), (1,)), ((), ())),
        preferred_element_type=jnp.float32)


def gate_logits(x2d, wg, tm):
    T, H = x2d.shape
    E = wg.shape[0]
    T_pad = _round_up(T, tm)
    E_pad = _round_up(max(E, 128), 128)
    x_pad = jnp.zeros((T_pad, H), x2d.dtype).at[:T].set(x2d)
    wg_p = jnp.zeros((E_pad, H), x2d.dtype).at[:E].set(wg.astype(x2d.dtype))
    out = pl.pallas_call(
        _gate_kernel,
        out_shape=jax.ShapeDtypeStruct((T_pad, E_pad), jnp.float32),
        grid_spec=pltpu.PrefetchScalarGridSpec(
            num_scalar_prefetch=0,
            grid=(T_pad // tm,),
            in_specs=[
                pl.BlockSpec((tm, H), lambda i: (i, 0)),
                pl.BlockSpec((E_pad, H), lambda i: (0, 0)),
            ],
            out_specs=pl.BlockSpec((tm, E_pad), lambda i: (i, 0)),
        ),
        compiler_params=pltpu.CompilerParams(dimension_semantics=("parallel",)),
    )(x_pad, wg_p)
    return out[:T, :E]


# ---------------------------------------------------------------------------
# Kernel 2: grouped expert MLP.  Grid (group tiles, F tiles); every tile belongs to
# exactly one expert (scalar-prefetched per-tile expert index).  F is a reduction axis
# over an f32 VMEM accumulator; the output tile is written once, lane-dense.
#   g = x @ w1_f^T ; u = x @ w3_f^T ; h = silu(g)*u ; acc += h @ w2_f^T
# Routing weights are applied outside (f32 scatter-add), matching the PyTorch order.
# ---------------------------------------------------------------------------
def _moe_group_kernel(eidx_ref, fidx_ref, act_ref,        # scalar prefetch (SMEM)
                      x_ref, w1_ref, w3_ref, w2_ref,      # VMEM tiles
                      o_ref,                              # (tm, H) output tile
                      acc_ref):                           # f32 VMEM accumulator
    t = pl.program_id(0)
    f = pl.program_id(1)

    @pl.when(f == 0)
    def _init():
        acc_ref[...] = jnp.zeros_like(acc_ref)

    @pl.when(act_ref[t] > 0)                              # dead (padding) tiles skipped
    def _compute():
        dn = (((1,), (1,)), ((), ()))
        x = x_ref[...]                                    # (tm, H), native dtype
        g = jax.lax.dot_general(x, w1_ref[0], dn, preferred_element_type=jnp.float32)
        u = jax.lax.dot_general(x, w3_ref[0], dn, preferred_element_type=jnp.float32)
        h = (jax.nn.silu(g) * u).astype(w2_ref.dtype)     # (tm, tf)
        acc_ref[...] += jax.lax.dot_general(              # (tm, H), f32 accumulation
            h, w2_ref[0], dn, preferred_element_type=jnp.float32)

    @pl.when(f == pl.num_programs(1) - 1)
    def _store():
        o_ref[...] = acc_ref[...].astype(o_ref.dtype)


def moe_grouped(x_grouped, w1, w3, w2, tile_expert, tile_fidx, tile_active,
                *, tm, tf, vmem_limit):
    rows, H = x_grouped.shape
    F = w1.shape[1]
    n_tiles = rows // tm
    F_t = F // tf

    # TODO(synk): per-generation pipeline depth (pl.Buffered(3) on the weight streams
    # for v5e near the compute/DMA balance point) is not set here.
    return pl.pallas_call(
        _moe_group_kernel,
        out_shape=jax.ShapeDtypeStruct((rows, H), jnp.float32),
        grid_spec=pltpu.PrefetchScalarGridSpec(
            num_scalar_prefetch=3,
            grid=(n_tiles, F_t),
            in_specs=[
                # grouped activations: resident across the F reduction
                pl.BlockSpec((tm, H), lambda t, f, ei, fi, ac: (t, 0)),
                # w1 / w3 tiles (tf, H): contraction dim H last -> no transpose
                pl.BlockSpec((1, tf, H),
                             lambda t, f, ei, fi, ac: (ei[t], fi[t * F_t + f], 0)),
                pl.BlockSpec((1, tf, H),
                             lambda t, f, ei, fi, ac: (ei[t], fi[t * F_t + f], 0)),
                # w2 tile (H, tf): contraction dim tf last -> no transpose
                pl.BlockSpec((1, H, tf),
                             lambda t, f, ei, fi, ac: (ei[t], 0, fi[t * F_t + f])),
            ],
            out_specs=pl.BlockSpec((tm, H), lambda t, f, ei, fi, ac: (t, 0)),
            scratch_shapes=[pltpu.VMEM((tm, H), jnp.float32)],
        ),
        compiler_params=pltpu.CompilerParams(
            # tile axis parallel (megacore / v7x dual-TC can take disjoint tiles,
            # including decode where different active experts land in different tiles)
            dimension_semantics=("parallel", "arbitrary"),
            vmem_limit_bytes=vmem_limit,
        ),
    )(tile_expert, tile_fidx, tile_active, x_grouped, w1, w3, w2)


# ---------------------------------------------------------------------------
# Full module forward
# ---------------------------------------------------------------------------
@functools.partial(jax.jit, static_argnames=("top_k",))
def mixtral_sparse_moe_forward(hidden_states, wg, w1, w3, w2, top_k):
    B, S, H = hidden_states.shape
    in_dtype = hidden_states.dtype
    T = B * S
    E, F, _ = w1.shape
    K = top_k
    rows = T * K

    x2d = hidden_states.reshape(T, H)

    # ---- router: Pallas gate matmul (native dtype, f32 accumulation) ----
    tm_g = max(16, _round_up(min(T, 256), 16))
    router_logits = gate_logits(x2d, wg, tm_g)                          # (T, E) f32

    # softmax + top-k + renormalize (tiny glue)
    # TODO(synk): softmax / top-k routing has no clean Pallas primitive; kept in JAX.
    routing = jax.nn.softmax(router_logits, axis=-1)
    top_w, top_i = jax.lax.top_k(routing, K)                            # (T, K)
    top_w = top_w / jnp.sum(top_w, axis=-1, keepdims=True)

    # ---- tile-size / VMEM derivation ----
    vmem_cap = _vmem_capacity_bytes()
    tm = _pick_tm(rows)
    tf = _pick_tf(F, H, tm, jnp.dtype(w1.dtype).itemsize,
                  jnp.dtype(in_dtype).itemsize, int(vmem_cap * 0.6))
    F_t = F // tf
    tiles_max = -(-rows // tm) + min(E, rows)       # static upper bound on group tiles
    rows_max = tiles_max * tm
    vmem_limit = int(max(32 << 20, min(int(vmem_cap * 0.75), 100 << 20)))

    # ---- group (token, k) pairs by expert (megablox-style), pad groups to tm ----
    # TODO(synk): true ragged group boundaries (no per-group padding) would need a
    # masked grouped-matmul kernel; padded rows are zero so they contribute nothing.
    t_idx = jnp.repeat(jnp.arange(T, dtype=jnp.int32), K)               # (rows,)
    e_sel = top_i.reshape(-1).astype(jnp.int32)                         # (rows,)
    w_sel = top_w.reshape(-1).astype(jnp.float32)                       # (rows,)

    order = jnp.argsort(e_sel)
    es, ts, ws = e_sel[order], t_idx[order], w_sel[order]

    counts = jnp.bincount(e_sel, length=E).astype(jnp.int32)            # (E,)
    padded = ((counts + tm - 1) // tm) * tm
    zero1 = jnp.zeros((1,), jnp.int32)
    grp_start = jnp.concatenate([zero1, jnp.cumsum(padded)[:-1].astype(jnp.int32)])
    raw_start = jnp.concatenate([zero1, jnp.cumsum(counts)[:-1].astype(jnp.int32)])
    rank = jnp.arange(rows, dtype=jnp.int32) - raw_start[es]
    dest = grp_start[es] + rank                                         # unique rows

    x_grouped = jnp.zeros((rows_max, H), in_dtype).at[dest].set(x2d[ts])
    w_grouped = jnp.zeros((rows_max,), jnp.float32).at[dest].set(ws)
    scat_idx = jnp.full((rows_max,), T, jnp.int32).at[dest].set(ts)     # T = dump row

    # per-tile expert index / activity; dead tiles remapped to the already-resident
    # weight block so they trigger neither DMA nor compute
    tiles_per_e = (padded // tm).astype(jnp.int32)
    tile_cum = jnp.cumsum(tiles_per_e)
    total_tiles = tile_cum[-1]
    tid = jnp.arange(tiles_max, dtype=jnp.int32)
    tile_expert = jnp.clip(jnp.searchsorted(tile_cum, tid, side="right"),
                           0, E - 1).astype(jnp.int32)
    tile_active = (tid < total_tiles).astype(jnp.int32)
    last_e = tile_expert[jnp.maximum(total_tiles - 1, 0)]
    tile_expert = jnp.where(tile_active > 0, tile_expert, last_e)
    tile_fidx = jnp.where(tile_active[:, None] > 0,
                          jnp.arange(F_t, dtype=jnp.int32)[None, :],
                          F_t - 1).astype(jnp.int32).reshape(-1)        # (tiles_max*F_t,)

    # ---- grouped expert MLP (Pallas) ----
    y_grouped = moe_grouped(x_grouped, w1, w3, w2,
                            tile_expert, tile_fidx, tile_active,
                            tm=tm, tf=tf, vmem_limit=vmem_limit)        # (rows_max, H) f32

    # ---- apply routing weights + scatter-add back to token order (f32, like PyTorch) ----
    contrib = y_grouped * w_grouped[:, None]
    final = jnp.zeros((T + 1, H), jnp.float32).at[scat_idx].add(contrib)[:T]
    final = final.astype(in_dtype).reshape(B, S, H)
    return final, router_logits


# pure-JAX reference mirroring the kernel math (native-dtype gate with f32 accumulation,
# f32 MXU accumulation in the experts, routing weight applied after the down projection)
def reference_forward(hidden_states, wg, w1, w3, w2, top_k):
    B, S, H = hidden_states.shape
    in_dtype = hidden_states.dtype
    x = hidden_states.reshape(-1, H)
    dn = (((1,), (1,)), ((), ()))
    logits = jax.lax.dot_general(x, wg.astype(x.dtype), dn,
                                 preferred_element_type=jnp.float32)
    routing = jax.nn.softmax(logits, axis=-1)
    top_w, top_i = jax.lax.top_k(routing, top_k)
    top_w = top_w / jnp.sum(top_w, axis=-1, keepdims=True)
    T, E = logits.shape
    dense_w = jnp.zeros((T, E), jnp.float32).at[
        jnp.arange(T)[:, None], top_i].add(top_w)
    out = jnp.zeros((T, H), jnp.float32)
    for e in range(E):
        g = jax.lax.dot_general(x, w1[e], dn, preferred_element_type=jnp.float32)
        u = jax.lax.dot_general(x, w3[e], dn, preferred_element_type=jnp.float32)
        h = (jax.nn.silu(g) * u).astype(w2.dtype)
        y = jax.lax.dot_general(h, w2[e], dn, preferred_element_type=jnp.float32)
        out = out + dense_w[:, e:e + 1] * y
    return out.astype(in_dtype).reshape(B, S, H), logits


if __name__ == "__main__":
    # small shapes consistent with the module's forward
    B, S, H = 2, 8, 64           # batch, seq, hidden_dim (in_features)
    E, K, F = 8, 2, 128          # num_experts, top_k, expert intermediate dim

    key = jax.random.PRNGKey(0)
    k_x, k_g, k_1, k_3, k_2 = jax.random.split(key, 5)

    hs = jax.random.normal(k_x, (B, S, H), jnp.float32)
    wg = jax.random.normal(k_g, (E, H), jnp.float32) * 0.05
    w1 = jax.random.normal(k_1, (E, F, H), jnp.float32) * 0.05
    w3 = jax.random.normal(k_3, (E, F, H), jnp.float32) * 0.05
    w2 = jax.random.normal(k_2, (E, H, F), jnp.float32) * 0.05

    # --- f32 path (module default dtype_) ---
    final, logits = mixtral_sparse_moe_forward(hs, wg, w1, w3, w2, top_k=K)
    jax.block_until_ready((final, logits))
    ref_final, ref_logits = reference_forward(hs, wg, w1, w3, w2, K)
    assert jnp.allclose(logits, ref_logits, atol=1e-4, rtol=1e-4), "router logits mismatch"
    assert jnp.allclose(final, ref_final, atol=2e-3, rtol=2e-3), "f32 output mismatch"

    # --- bf16 activations / expert weights (f32 MXU accumulation) ---
    hs_bf = hs.astype(jnp.bfloat16)
    w1_bf, w3_bf, w2_bf = (a.astype(jnp.bfloat16) for a in (w1, w3, w2))
    final_bf, logits_bf = mixtral_sparse_moe_forward(
        hs_bf, wg, w1_bf, w3_bf, w2_bf, top_k=K)
    jax.block_until_ready((final_bf, logits_bf))
    ref_final_bf, ref_logits_bf = reference_forward(hs_bf, wg, w1_bf, w3_bf, w2_bf, K)
    assert jnp.allclose(logits_bf, ref_logits_bf, atol=5e-2, rtol=5e-2)
    assert jnp.allclose(final_bf.astype(jnp.float32), ref_final_bf.astype(jnp.float32),
                        atol=3e-2, rtol=3e-2), "bf16 output mismatch"

    # --- tiny batch (decode-like): only top_k experts active, dead-tile skip path ---
    hs1 = hs[:1, :1]
    final1, logits1 = mixtral_sparse_moe_forward(hs1, wg, w1, w3, w2, top_k=K)
    jax.block_until_ready((final1, logits1))
    ref_final1, ref_logits1 = reference_forward(hs1, wg, w1, w3, w2, K)
    assert jnp.allclose(logits1, ref_logits1, atol=1e-4, rtol=1e-4)
    assert jnp.allclose(final1, ref_final1, atol=2e-3, rtol=2e-3), "decode-path mismatch"

    print("KERNEL_OK")
</pallas_src>

<mosaic_0001>
module attributes {stable_mosaic.version = 11 : i64} {
  func.func private @main(%arg0: i32) attributes {dimension_semantics = [#tpu.dimension_semantics<core_parallel>], iteration_bounds = array<i64: 2>, tpu.core_type = #tpu.core_type<sc_scalar_subcore>, window_params = []} {
    return
  }
}

module attributes {stable_mosaic.version = 11 : i64} {
  func.func private @main(%arg0: i32) attributes {dimension_semantics = [#tpu.dimension_semantics<core_parallel>], iteration_bounds = array<i64: 2>, tpu.core_type = #tpu.core_type<sc_scalar_subcore>, window_params = []} {
    return
  }
}

module attributes {stable_mosaic.version = 11 : i64} {
  func.func @_gate_kernel(%arg0: i32, %arg1: memref<16x64xf32, #tpu.memory_space<vmem>>, %arg2: memref<128x64xf32, #tpu.memory_space<vmem>>, %arg3: memref<16x128xf32, #tpu.memory_space<vmem>>) attributes {dimension_semantics = [#tpu.dimension_semantics<parallel>], iteration_bounds = array<i64: 1>, scalar_prefetch = 0 : i64, scratch_operands = 0 : i64, tpu.core_type = #tpu.core_type<tc>, window_params = [{transform_indices = @transform_0, window_bounds = array<i64: 16, 64>}, {pipeline_mode = #tpu.pipeline_mode<synchronous>, transform_indices = @transform_1, window_bounds = array<i64: 128, 64>}, {transform_indices = @transform_2, window_bounds = array<i64: 16, 128>}]} {
    %c0 = arith.constant 0 : index
    %c0_0 = arith.constant 0 : index
    %0 = vector.load %arg1[%c0, %c0_0] : memref<16x64xf32, #tpu.memory_space<vmem>>, vector<16x64xf32>
    %c0_1 = arith.constant 0 : index
    %c0_2 = arith.constant 0 : index
    %1 = vector.load %arg2[%c0_1, %c0_2] : memref<128x64xf32, #tpu.memory_space<vmem>>, vector<128x64xf32>
    %cst = arith.constant dense<0.000000e+00> : vector<16x128xf32>
    %2 = tpu.matmul %0, %1, %cst {dimension_numbers = #tpu.dot_dimension_numbers<[1], [1], [0], [0], [0, 0, 1, 0], [], []>} : vector<16x64xf32>, vector<128x64xf32>, vector<16x128xf32> -> vector<16x128xf32>
    %c0_3 = arith.constant 0 : index
    %c0_4 = arith.constant 0 : index
    %3 = vector.load %arg3[%c0_3, %c0_4] : memref<16x128xf32, #tpu.memory_space<vmem>>, vector<16x128xf32>
    tpu.vector_store %arg3[%c0_3, %c0_4], %2 {strides = array<i32>} : memref<16x128xf32, #tpu.memory_space<vmem>>, vector<16x128xf32>,
    return
  }
  func.func @transform_0(%arg0: i32) -> (i32, i32) {
    %c0_i32 = arith.constant 0 : i32
    %c0_i32_0 = arith.constant 0 : i32
    return %arg0, %c0_i32 : i32, i32
  }
  func.func @transform_1(%arg0: i32) -> (i32, i32) {
    %c0_i32 = arith.constant 0 : i32
    %c0_i32_0 = arith.constant 0 : i32
    %c0_i32_1 = arith.constant 0 : i32
    return %c0_i32, %c0_i32_0 : i32, i32
  }
  func.func @transform_2(%arg0: i32) -> (i32, i32) {
    %c0_i32 = arith.constant 0 : i32
    %c0_i32_0 = arith.constant 0 : i32
    return %arg0, %c0_i32 : i32, i32
  }
}

module attributes {stable_mosaic.version = 11 : i64} {
  func.func @_moe_group_kernel(%arg0: i32, %arg1: i32, %arg2: memref<9xi32, #tpu.memory_space<smem>>, %arg3: memref<9xi32, #tpu.memory_space<smem>>, %arg4: memref<9xi32, #tpu.memory_space<smem>>, %arg5: memref<32x64xf32, #tpu.memory_space<vmem>>, %arg6: memref<1x128x64xf32, #tpu.memory_space<vmem>>, %arg7: memref<1x128x64xf32, #tpu.memory_space<vmem>>, %arg8: memref<1x64x128xf32, #tpu.memory_space<vmem>>, %arg9: memref<32x64xf32, #tpu.memory_space<vmem>>, %arg10: memref<32x64xf32, #tpu.memory_space<vmem>>) attributes {dimension_semantics = [#tpu.dimension_semantics<parallel>, #tpu.dimension_semantics<arbitrary>], iteration_bounds = array<i64: 9, 1>, scalar_prefetch = 3 : i64, scratch_operands = 1 : i64, tpu.core_type = #tpu.core_type<tc>, window_params = [{transform_indices = @transform_0, window_bounds = array<i64: 32, 64>}, {transform_indices = @transform_1, window_bounds = array<i64: 1, 128, 64>}, {transform_indices = @transform_2, window_bounds = array<i64: 1, 128, 64>}, {transform_indices = @transform_3, window_bounds = array<i64: 1, 64, 128>}, {transform_indices = @transform_4, window_bounds = array<i64: 32, 64>}]} {
    %c0_i32 = arith.constant 0 : i32
    %0 = arith.cmpi eq, %arg1, %c0_i32 : i32
    %1 = arith.extui %0 : i1 to i32
    %c0_i32_0 = arith.constant 0 : i32
    %2 = arith.cmpi ne, %1, %c0_i32_0 : i32
    scf.if %2 {
      %cst = arith.constant 0.000000e+00 : f32
      %11 = vector.broadcast %cst : f32 to vector<32x64xf32>
      %c0 = arith.constant 0 : index
      %c0_5 = arith.constant 0 : index
      %12 = vector.load %arg10[%c0, %c0_5] : memref<32x64xf32, #tpu.memory_space<vmem>>, vector<32x64xf32>
      tpu.vector_store %arg10[%c0, %c0_5], %11 {strides = array<i32>} : memref<32x64xf32, #tpu.memory_space<vmem>>, vector<32x64xf32>,
    } else {
    }
    %3 = arith.index_cast %arg0 : i32 to index
    %4 = memref.load %arg4[%3] : memref<9xi32, #tpu.memory_space<smem>>
    %c0_i32_1 = arith.constant 0 : i32
    %5 = arith.cmpi sgt, %4, %c0_i32_1 : i32
    %6 = arith.extui %5 : i1 to i32
    %c0_i32_2 = arith.constant 0 : i32
    %7 = arith.cmpi ne, %6, %c0_i32_2 : i32
    scf.if %7 {
      %c0 = arith.constant 0 : index
      %c0_5 = arith.constant 0 : index
      %11 = vector.load %arg5[%c0, %c0_5] : memref<32x64xf32, #tpu.memory_space<vmem>>, vector<32x64xf32>
      %c0_6 = arith.constant 0 : index
      %c0_7 = arith.constant 0 : index
      %c0_8 = arith.constant 0 : index
      %12 = vector.load %arg6[%c0_6, %c0_7, %c0_8] : memref<1x128x64xf32, #tpu.memory_space<vmem>>, vector<1x128x64xf32>
      %13 = vector.shape_cast %12 : vector<1x128x64xf32> to vector<128x64xf32>
      %cst = arith.constant dense<0.000000e+00> : vector<32x128xf32>
      %14 = tpu.matmul %11, %13, %cst {dimension_numbers = #tpu.dot_dimension_numbers<[1], [1], [0], [0], [0, 0, 1, 0], [], []>} : vector<32x64xf32>, vector<128x64xf32>, vector<32x128xf32> -> vector<32x128xf32>
      %c0_9 = arith.constant 0 : index
      %c0_10 = arith.constant 0 : index
      %c0_11 = arith.constant 0 : index
      %15 = vector.load %arg7[%c0_9, %c0_10, %c0_11] : memref<1x128x64xf32, #tpu.memory_space<vmem>>, vector<1x128x64xf32>
      %16 = vector.shape_cast %15 : vector<1x128x64xf32> to vector<128x64xf32>
      %cst_12 = arith.constant dense<0.000000e+00> : vector<32x128xf32>
      %17 = tpu.matmul %11, %16, %cst_12 {dimension_numbers = #tpu.dot_dimension_numbers<[1], [1], [0], [0], [0, 0, 1, 0], [], []>} : vector<32x64xf32>, vector<128x64xf32>, vector<32x128xf32> -> vector<32x128xf32>
      %18 = arith.negf %14 : vector<32x128xf32>
      %19 = math.exp %18 : vector<32x128xf32>
      %cst_13 = arith.constant 1.000000e+00 : f32
      %20 = vector.broadcast %cst_13 : f32 to vector<32x128xf32>
      %21 = arith.addf %20, %19 : vector<32x128xf32>
      %22 = arith.divf %20, %21 : vector<32x128xf32>
      %23 = arith.mulf %14, %22 : vector<32x128xf32>
      %24 = arith.mulf %23, %17 : vector<32x128xf32>
      %c0_14 = arith.constant 0 : index
      %c0_15 = arith.constant 0 : index
      %25 = vector.load %arg10[%c0_14, %c0_15] : memref<32x64xf32, #tpu.memory_space<vmem>>, vector<32x64xf32>
      %c0_16 = arith.constant 0 : index
      %c0_17 = arith.constant 0 : index
      %c0_18 = arith.constant 0 : index
      %26 = vector.load %arg8[%c0_16, %c0_17, %c0_18] : memref<1x64x128xf32, #tpu.memory_space<vmem>>, vector<1x64x128xf32>
      %27 = vector.shape_cast %26 : vector<1x64x128xf32> to vector<64x128xf32>
      %cst_19 = arith.constant dense<0.000000e+00> : vector<32x64xf32>
      %28 = tpu.matmul %24, %27, %cst_19 {dimension_numbers = #tpu.dot_dimension_numbers<[1], [1], [0], [0], [0, 0, 1, 0], [], []>} : vector<32x128xf32>, vector<64x128xf32>, vector<32x64xf32> -> vector<32x64xf32>
      %29 = arith.addf %25, %28 : vector<32x64xf32>
      %c0_20 = arith.constant 0 : index
      %c0_21 = arith.constant 0 : index
      %30 = vector.load %arg10[%c0_20, %c0_21] : memref<32x64xf32, #tpu.memory_space<vmem>>, vector<32x64xf32>
      tpu.vector_store %arg10[%c0_20, %c0_21], %29 {strides = array<i32>} : memref<32x64xf32, #tpu.memory_space<vmem>>, vector<32x64xf32>,
    } else {
    }
    %c0_i32_3 = arith.constant 0 : i32
    %8 = arith.cmpi eq, %arg1, %c0_i32_3 : i32
    %9 = arith.extui %8 : i1 to i32
    %c0_i32_4 = arith.constant 0 : i32
    %10 = arith.cmpi ne, %9, %c0_i32_4 : i32
    scf.if %10 {
      %c0 = arith.constant 0 : index
      %c0_5 = arith.constant 0 : index
      %11 = vector.load %arg10[%c0, %c0_5] : memref<32x64xf32, #tpu.memory_space<vmem>>, vector<32x64xf32>
      %c0_6 = arith.constant 0 : index
      %c0_7 = arith.constant 0 : index
      %12 = vector.load %arg9[%c0_6, %c0_7] : memref<32x64xf32, #tpu.memory_space<vmem>>, vector<32x64xf32>
      tpu.vector_store %arg9[%c0_6, %c0_7], %11 {strides = array<i32>} : memref<32x64xf32, #tpu.memory_space<vmem>>, vector<32x64xf32>,
    } else {
    }
    return
  }
  func.func @transform_0(%arg0: i32, %arg1: i32, %arg2: memref<9xi32, #tpu.memory_space<smem>>, %arg3: memref<9xi32, #tpu.memory_space<smem>>, %arg4: memref<9xi32, #tpu.memory_space<smem>>) -> (i32, i32) {
    %c0_i32 = arith.constant 0 : i32
    %c0_i32_0 = arith.constant 0 : i32
    return %arg0, %c0_i32 : i32, i32
  }
  func.func @transform_1(%arg0: i32, %arg1: i32, %arg2: memref<9xi32, #tpu.memory_space<smem>>, %arg3: memref<9xi32, #tpu.memory_space<smem>>, %arg4: memref<9xi32, #tpu.memory_space<smem>>) -> (i32, i32, i32) {
    %0 = arith.index_cast %arg0 : i32 to index
    %1 = memref.load %arg2[%0] : memref<9xi32, #tpu.memory_space<smem>>
    %c1_i32 = arith.constant 1 : i32
    %2 = arith.muli %arg0, %c1_i32 : i32
    %3 = arith.addi %2, %arg1 : i32
    %4 = arith.index_cast %3 : i32 to index
    %5 = memref.load %arg3[%4] : memref<9xi32, #tpu.memory_space<smem>>
    %c0_i32 = arith.constant 0 : i32
    %c0_i32_0 = arith.constant 0 : i32
    return %1, %5, %c0_i32 : i32, i32, i32
  }
  func.func @transform_2(%arg0: i32, %arg1: i32, %arg2: memref<9xi32, #tpu.memory_space<smem>>, %arg3: memref<9xi32, #tpu.memory_space<smem>>, %arg4: memref<9xi32, #tpu.memory_space<smem>>) -> (i32, i32, i32) {
    %0 = arith.index_cast %arg0 : i32 to index
    %1 = memref.load %arg2[%0] : memref<9xi32, #tpu.memory_space<smem>>
    %c1_i32 = arith.constant 1 : i32
    %2 = arith.muli %arg0, %c1_i32 : i32
    %3 = arith.addi %2, %arg1 : i32
    %4 = arith.index_cast %3 : i32 to index
    %5 = memref.load %arg3[%4] : memref<9xi32, #tpu.memory_space<smem>>
    %c0_i32 = arith.constant 0 : i32
    %c0_i32_0 = arith.constant 0 : i32
    return %1, %5, %c0_i32 : i32, i32, i32
  }
  func.func @transform_3(%arg0: i32, %arg1: i32, %arg2: memref<9xi32, #tpu.memory_space<smem>>, %arg3: memref<9xi32, #tpu.memory_space<smem>>, %arg4: memref<9xi32, #tpu.memory_space<smem>>) -> (i32, i32, i32) {
    %0 = arith.index_cast %arg0 : i32 to index
    %1 = memref.load %arg2[%0] : memref<9xi32, #tpu.memory_space<smem>>
    %c1_i32 = arith.constant 1 : i32
    %2 = arith.muli %arg0, %c1_i32 : i32
    %3 = arith.addi %2, %arg1 : i32
    %4 = arith.index_cast %3 : i32 to index
    %5 = memref.load %arg3[%4] : memref<9xi32, #tpu.memory_space<smem>>
    %c0_i32 = arith.constant 0 : i32
    %c0_i32_0 = arith.constant 0 : i32
    return %1, %c0_i32, %5 : i32, i32, i32
  }
  func.func @transform_4(%arg0: i32, %arg1: i32, %arg2: memref<9xi32, #tpu.memory_space<smem>>, %arg3: memref<9xi32, #tpu.memory_space<smem>>, %arg4: memref<9xi32, #tpu.memory_space<smem>>) -> (i32, i32) {
    %c0_i32 = arith.constant 0 : i32
    %c0_i32_0 = arith.constant 0 : i32
    return %arg0, %c0_i32 : i32, i32
  }
}

</mosaic_0001>

<bundles_post_ra>
// kernel: custom-call.1
= control target key start
LH: loop header
LB: loop body
LE: loop exit
PB: predicated region body
PF: predicated region fallthrough
CT: control target
= control target key end

     0   :  { %s6_s0 = inlined_call_operand.vmem [shape: u32[9], index: 0, kind: output, shape index: {}]  }

// kernel: mixtral_sparse_moe_forward.2
= control target key start
LH: loop header
LB: loop body
LE: loop exit
PB: predicated region body
PF: predicated region fallthrough
CT: control target
= control target key end

     0   :  { %vm29_vm0 = vcmask 523264   ;;  %s345_s1 = inlined_call_operand.vmem [shape: f32[128,64], index: 1, kind: input, shape index: {}]   ;;  %s346_s0 = inlined_call_operand.vmem [shape: f32[16,64], index: 0, kind: input, shape index: {}]   ;;  %s347_s2 = inlined_call_operand.vmem [shape: f32[16,128], index: 2, kind: output, shape index: {}]  }
   0x1   :  { %v28_v0 = vld [vmem:[%s345_s1 + $0x78] sm:$0xff]  ;;  %v27_v1 = vld [vmem:[%s345_s1 + $0x70] sm:$0xff]  ;;  %v26_v2 = vld [vmem:[%s345_s1 + $0x68] sm:$0xff] }
   0x2   :  { %201 = vmatprep.subr.msk.mxu0 %vm29_vm0, %v28_v0  ;;  %v11_v3 = vld [vmem:[%s346_s0] sm:$0xff]  ;;  %v24_v5 = vld [vmem:[%s345_s1 + $0x58] sm:$0xff]  ;;  %v23_v6 = vld [vmem:[%s345_s1 + $0x50] sm:$0xff] }
   0x3   :  { %202 = vmatpush3.xpose.msk.msra.mxu0 %vm29_vm0, %v28_v0  ;;  %233 = vmatprep.mubr.msk.f32.mxu0 %vm29_vm0, %v11_v3  ;;  %v25_v4 = vld [vmem:[%s345_s1 + $0x60] sm:$0xff]  ;;  %v22_v7 = vld [vmem:[%s345_s1 + $0x48] sm:$0xff]  ;;  %v20_v9 = vld [vmem:[%s345_s1 + $0x38] sm:$0xff] }
   0x4   :  { %203 = vmatprep.subr.msk.mxu0 %vm29_vm0, %v27_v1  ;;  %v21_v8 = vld [vmem:[%s345_s1 + $0x40] sm:$0xff]  ;;  %v19_v10 = vld [vmem:[%s345_s1 + $0x30] sm:$0xff]  ;;  %v18_v11 = vld [vmem:[%s345_s1 + $0x28] sm:$0xff] }
   0x5   :  { %v17_v12 = vld [vmem:[%s345_s1 + $0x20] sm:$0xff]  ;;  %v16_v13 = vld [vmem:[%s345_s1 + $0x18] sm:$0xff]  ;;  %v15_v14 = vld [vmem:[%s345_s1 + $0x10] sm:$0xff] }
   0x6   :  { %v14_v15 = vld [vmem:[%s345_s1 + $0x8] sm:$0xff]  ;;  %v13_v16 = vld [vmem:[%s345_s1] sm:$0xff] }
   0x7   :  { %204 = vmatpush3.xpose.msk.msra.mxu0 %vm29_vm0, %v27_v1  ;;  %v12_v17 = vld [vmem:[%s346_s0 + $0x8] sm:$0xff] }
   0x8   :  { %205 = vmatprep.subr.msk.mxu0 %vm29_vm0, %v26_v2 }
   0xb   :  { %206 = vmatpush3.xpose.msk.msra.mxu0 %vm29_vm0, %v26_v2 }
   0xc   :  { %207 = vmatprep.subr.msk.mxu0 %vm29_vm0, %v25_v4 }
   0xf   :  { %208 = vmatpush3.xpose.msk.msra.mxu0 %vm29_vm0, %v25_v4 }
  0x10   :  { %209 = vmatprep.subr.msk.mxu0 %vm29_vm0, %v24_v5 }
  0x13   :  { %210 = vmatpush3.xpose.msk.msra.mxu0 %vm29_vm0, %v24_v5 }
  0x14   :  { %211 = vmatprep.subr.msk.mxu0 %vm29_vm0, %v23_v6 }
  0x17   :  { %212 = vmatpush3.xpose.msk.msra.mxu0 %vm29_vm0, %v23_v6 }
  0x18   :  { %213 = vmatprep.subr.msk.mxu0 %vm29_vm0, %v22_v7 }
  0x1b   :  { %214 = vmatpush3.xpose.msk.msra.mxu0 %vm29_vm0, %v22_v7 }
  0x1c   :  { %215 = vmatprep.subr.msk.mxu0 %vm29_vm0, %v21_v8 }
  0x1f   :  { %216 = vmatpush3.xpose.msk.msra.mxu0 %vm29_vm0, %v21_v8 }
  0x20   :  { %217 = vmatprep.subr.msk.mxu0 %vm29_vm0, %v20_v9 }
  0x23   :  { %218 = vmatpush3.xpose.msk.msra.mxu0 %vm29_vm0, %v20_v9 }
  0x24   :  { %219 = vmatprep.subr.msk.mxu0 %vm29_vm0, %v19_v10 }
  0x27   :  { %220 = vmatpush3.xpose.msk.msra.mxu0 %vm29_vm0, %v19_v10 }
  0x28   :  { %221 = vmatprep.subr.msk.mxu0 %vm29_vm0, %v18_v11 }
  0x2b   :  { %222 = vmatpush3.xpose.msk.msra.mxu0 %vm29_vm0, %v18_v11 }
  0x2c   :  { %223 = vmatprep.subr.msk.mxu0 %vm29_vm0, %v17_v12 }
  0x2f   :  { %224 = vmatpush3.xpose.msk.msra.mxu0 %vm29_vm0, %v17_v12 }
  0x30   :  { %225 = vmatprep.subr.msk.mxu0 %vm29_vm0, %v16_v13 }
  0x33   :  { %226 = vmatpush3.xpose.msk.msra.mxu0 %vm29_vm0, %v16_v13 }
  0x34   :  { %227 = vmatprep.subr.msk.mxu0 %vm29_vm0, %v15_v14 }
  0x37   :  { %228 = vmatpush3.xpose.msk.msra.mxu0 %vm29_vm0, %v15_v14 }
  0x38   :  { %229 = vmatprep.subr.msk.mxu0 %vm29_vm0, %v14_v15 }
  0x3b   :  { %230 = vmatpush3.xpose.msk.msra.mxu0 %vm29_vm0, %v14_v15 }
  0x3c   :  { %231 = vmatprep.subr.msk.mxu0 %vm29_vm0, %v13_v16 }
  0x3f   :  { %232 = vmatpush3.xpose.msk.msra.mxu0 %vm29_vm0, %v13_v16 }
  0x42   :  { %234 = vmatmul.mubr.msk.f32.vlgmr.msra.gmra.mxu0 %vm29_vm0, %v12_v17 }
 0x102   :  { %v235_v18 = vpop.f32.mrf.mxu0 }
 0x103   :  { %160 = vst [vmem:[%s347_s2 + $0x8] sm:$0xff] %v235_v18 }
 0x104   :  { %v150_v19 = vpop.f32.mrf.mxu0 }
 0x105   :  { %159 = vst [vmem:[%s347_s2] sm:$0xff] %v150_v19 }

// kernel: mixtral_sparse_moe_forward.3
= control target key start
LH: loop header
LB: loop body
LE: loop exit
PB: predicated region body
PF: predicated region fallthrough
CT: control target
= control target key end

     0   :  { %s1579_s0 = inlined_call_operand.vmem [shape: s32[9], index: 0, kind: input, shape index: {}]   ;;  %s1580_s3 = inlined_call_operand.vmem [shape: f32[288,64], index: 3, kind: input, shape index: {}]   ;;  %s1581_s4 = inlined_call_operand.vmem [shape: f32[8,128,64], index: 4, kind: input, shape index: {}]   ;;  %s1582_s5 = inlined_call_operand.vmem [shape: f32[8,128,64], index: 5, kind: input, shape index: {}]   ;;  %s1583_s6 = inlined_call_operand.vmem [shape: f32[8,64,128], index: 6, kind: input, shape index: {}]   ;;  %s1584_s7 = inlined_call_operand.vmem [shape: f32[288,64], index: 7, kind: output, shape index: {}]   ;;  %s1585_s1 = inlined_call_operand.vmem [shape: s32[9], index: 1, kind: input, shape index: {}]   ;;  %s1586_s2 = inlined_call_operand.vmem [shape: s32[9], index: 2, kind: input, shape index: {}]  }
   0x1   :  { %s12_s26 = sshll.u32 %s1579_s0, 4  ;;  %s16_s29 = sshll.u32 %s1585_s1, 4  ;;  %s13_s26 = int_to_ptr.vmem [resolvable:$true] %s12_s26  ;;  %s17_s29 = int_to_ptr.vmem [resolvable:$true] %s16_s29 }
   0x2   :  { %s1267_s30 = scalar_lea.vmem %s13_s26, 16  ;;  %p1272_p1 = scmp.lt.s32.totalorder %s13_s26, %s13_s26 }
   0x3   :  { %p1268_p0 = scmp.ne.s32.totalorder %s13_s26, %s1267_s30  ;;  %p1273_p2 = scmp.lt.s32.totalorder %s1267_s30, %s1267_s30 }
   0x5   :  { %p1274_p3 = por %p1273_p2, %p1272_p1 }
   0x7   :  { %p1275_p4 = pnand %p1274_p3, %p1268_p0 }
   0x9   :  { %1278 = shalt.err (!%p1275_p4)  }
   0xa   :  { %s1329_s8 = smov [#allocation4]   ;;  %s1279_s9 = scalar_lea.vmem %s17_s29, 16 }
   0xb   :  { %15 = dma.vmem_to_smem %s13_s26, 16, %s1329_s8, [#allocation3] }
   0xc   :  { %p1280_p5 = scmp.ne.s32.totalorder %s17_s29, %s1279_s9  ;;  %p1284_p6 = scmp.lt.s32.totalorder %s17_s29, %s17_s29 }
   0xd   :  { %p1285_p7 = scmp.lt.s32.totalorder %s1279_s9, %s1279_s9 }
   0xf   :  { %p1286_p8 = por %p1285_p7, %p1284_p6 }
  0x11   :  { %p1287_p9 = pnand %p1286_p8, %p1280_p5 }
  0x13   :  { %1290 = shalt.err (!%p1287_p9)  }
  0x14   :  { %s1330_s0 = smov [#allocation5]   ;;  %s20_s11 = sshll.u32 %s1586_s2, 4  ;;  %s21_s11 = int_to_ptr.vmem [resolvable:$true] %s20_s11 }
  0x15   :  { %19 = dma.vmem_to_smem %s17_s29, 16, %s1330_s0, [#allocation3] }
  0x16   :  { %s1291_s12 = scalar_lea.vmem %s21_s11, 16  ;;  %p1296_p11 = scmp.lt.s32.totalorder %s21_s11, %s21_s11 }
  0x17   :  { %p1292_p10 = scmp.ne.s32.totalorder %s21_s11, %s1291_s12  ;;  %p1297_p12 = scmp.lt.s32.totalorder %s1291_s12, %s1291_s12 }
  0x19   :  { %p1298_p13 = por %p1297_p12, %p1296_p11 }
  0x1b   :  { %p1299_p0 = pnand %p1298_p13, %p1292_p10 }
  0x1d   :  { %1302 = shalt.err (!%p1299_p0)  }
  0x1e   :  { %s1331_s13 = smov [#allocation6]  }
  0x1f   :  { %23 = dma.vmem_to_smem %s21_s11, 16, %s1331_s13, [#allocation3] }
  0x20   :  { %1315 = dma.done.wait [#allocation3], 48 }
  0x21   :  { %1316 = vsyncadd [#allocation3], 4294967248 }
  0x22   :  { %25 = sfence }
  0x23   :  { %s1382_s14 = smov 0   ;;  %s1384_s15 = smov 0  }
  0x24   :  { %s1386_s16 = smov 0  }
  0x25 LB: > { %s43_s2 = sadd.s32 1, %s1323_s15  ;;  %p997_p1 = scmp.ge.s32.totalorder %s1327_s16, 1  ;;  %s1327_s16 = sphi %s1386_s16, %s31_s16   ;;  %s1323_s15 = sphi %s1384_s15, %s1588_s15   ;;  %s1319_s14 = sphi %s1382_s14, %s1587_s14  }
  0x26   : > { %p45_p2 = scmp.ge.s32.totalorder %s43_s2, 9  ;;  %p277_p3 = scmp.lt.s32.totalorder %s1327_s16, 10 }
  0x28   : > { %s1590_s2 = smov (%p45_p2, %s43_s2), 0  ;;  %p278_p4 = pnand %p997_p1, %p277_p3 }
  0x29   : > { %s998_s17 = sshll.u32 (!%p278_p4), %s1319_s14, 2  ;;  %s344_s18 = sld [smem:[#allocation4 + %s1319_s14]] (!%p278_p4) }
  0x2a   : > { %281 = sbr.rel (%p278_p4) target bundleno = 581 (0x245), region = 36  ;;  %p339_p5 = scmp.lt.s32.totalorder (!%p278_p4), %s998_s17, 35 }
  0x2b   : > { %s346_s19 = sld [smem:[#allocation5 + %s1319_s14]] (!%p278_p4) }
  0x2c   : > { %s360_s20 = sld [smem:[#allocation4 + %s1319_s14]] (!%p278_p4) }
  0x2d   : > { %s362_s21 = sld [smem:[#allocation5 + %s1319_s14]] (!%p278_p4) }
  0x2e   : > { %s376_s23 = sld [smem:[#allocation4 + %s1319_s14]] (!%p278_p4) }
  0x2f   : > { %vm400_vm0 = vcmask 523264   ;;  %v1332_v0 = vmov 0.0   ;;  %s1592_s17 = smov (!%p339_p5, %s998_s17), 35  ;;  %p348_p6 = scmp.lt.s32.totalorder %s344_s18, 7 }
  0x30   : > { %401 = vst.msk [vmem:[#allocation2] sm:$0xff] %vm400_vm0, %v1332_v0  ;;  %402 = vst.msk [vmem:[#allocation2 + $0x8] sm:$0xff] %vm400_vm0, %v1332_v0  ;;  %s999_s22 = sshll.u32 %s1592_s17, 3  ;;  %s378_s28 = sld [smem:[#allocation5 + %s1319_s14]] }
  0x31   : > { %403 = vst.msk [vmem:[#allocation2 + $0x10] sm:$0xff] %vm400_vm0, %v1332_v0  ;;  %404 = vst.msk [vmem:[#allocation2 + $0x18] sm:$0xff] %vm400_vm0, %v1332_v0  ;;  %s1418_s26 = scalar_lea.vmem %s1580_s3, %s999_s22  ;;  %s1000_s27 = sshll.u32 %s346_s19, 4 }
  0x32   : > { %s1594_s18 = smov (!%p348_p6, %s344_s18), 7  ;;  %p350_p7 = scmp.lt.s32.totalorder %s1000_s27, 15 }
  0x33   : > { %p364_p8 = scmp.lt.s32.totalorder %s360_s20, 7  ;;  %s1001_s29 = sshll.u32 %s1594_s18, 4 }
  0x34   : > { %s1003_s30 = sshll.u32 %s362_s21, 4  ;;  %s1596_s27 = smov (!%p350_p7, %s1000_s27), 15 }
  0x35   : > { %s1598_s20 = smov (!%p364_p8, %s360_s20), 7  ;;  %s353_s8 = sadd.s32 %s1001_s29, %s1596_s27 }
  0x36   : > { %p366_p9 = scmp.lt.s32.totalorder %s1003_s30, 15  ;;  %s1002_s9 = sshll.u32 %s353_s8, 3 }
  0x37   : > { %s1004_s0 = sshll.u32 %s1598_s20, 4  ;;  %s1424_s11 = scalar_lea.vmem %s1581_s4, %s1002_s9 }
  0x38   : > { %p379_p10 = scmp.lt.s32.totalorder %s376_s23, 7  ;;  %s1600_s30 = smov (!%p366_p9, %s1003_s30), 15 }
  0x39   : > { %s369_s12 = sadd.s32 %s1004_s0, %s1600_s30  ;;  %p381_p11 = scmp.lt.s32.totalorder %s378_s28, 0 }
  0x3a   : > { %s1602_s23 = smov (!%p379_p10, %s376_s23), 7  ;;  %s1005_s13 = sshll.u32 %s369_s12, 3 }
  0x3b   : > { %s1006_s17 = sshll.u32 %s1602_s23, 3  ;;  %s1429_s21 = scalar_lea.vmem %s1582_s5, %s1005_s13 }
  0x3c   : > { %s1434_s20 = scalar_lea.vmem %s1584_s7, %s999_s22  ;;  %s1604_s28 = smov (!%p381_p11, %s378_s28), 0 }
  0x3d   : > { %s405_s27 = sld [smem:[#allocation6 + %s1319_s14]]  ;;  %s384_s29 = sadd.s32 %s1006_s17, %s1604_s28 }
  0x3e   : > { %s1007_s8 = sshll.u32 %s384_s29, 3 }
  0x3f   : > { %s1440_s30 = scalar_lea.vmem %s1583_s6, %s1007_s8 }
  0x43   : > { %p1010_p12 = scmp.le.s32.totalorder %s405_s27, 0 }
  0x45   : > { %409 = sbr.rel (%p1010_p12) target bundleno = 573 (0x23d), region = 44 }
  0x4a   : > { %v429_v1 = vld [vmem:[%s1424_s11 + $0x78] sm:$0xff]  ;;  %v428_v2 = vld [vmem:[%s1424_s11 + $0x70] sm:$0xff]  ;;  %v427_v5 = vld [vmem:[%s1424_s11 + $0x68] sm:$0xff] }
  0x4b   : > { %1109 = vmatprep.subr.msk.mxu0 %vm400_vm0, %v429_v1  ;;  %v591_v3 = vld [vmem:[%s1429_s21 + $0x78] sm:$0xff]  ;;  %v590_v4 = vld [vmem:[%s1429_s21 + $0x70] sm:$0xff]  ;;  %v589_v6 = vld [vmem:[%s1429_s21 + $0x68] sm:$0xff] }
  0x4c   : > { %1110 = vmatpush3.xpose.msk.msra.mxu0 %vm400_vm0, %v429_v1  ;;  %1147 = vmatprep.subr.msk.mxu1 %vm400_vm0, %v591_v3  ;;  %v426_v7 = vld [vmem:[%s1424_s11 + $0x60] sm:$0xff]  ;;  %v425_v10 = vld [vmem:[%s1424_s11 + $0x58] sm:$0xff]  ;;  %v424_v12 = vld [vmem:[%s1424_s11 + $0x50] sm:$0xff] }
  0x4d   : > { %1111 = vmatprep.subr.msk.mxu0 %vm400_vm0, %v428_v2  ;;  %1148 = vmatpush3.xpose.msk.msra.mxu1 %vm400_vm0, %v591_v3  ;;  %v410_v8 = vld [vmem:[%s1418_s26] sm:$0xff]  ;;  %v587_v11 = vld [vmem:[%s1429_s21 + $0x58] sm:$0xff]  ;;  %v586_v13 = vld [vmem:[%s1429_s21 + $0x50] sm:$0xff] }
  0x4e   : > { %1149 = vmatprep.subr.msk.mxu1 %vm400_vm0, %v590_v4  ;;  %1141 = vmatprep.mubr.msk.f32.mxu0 %vm400_vm0, %v410_v8  ;;  %v588_v9 = vld [vmem:[%s1429_s21 + $0x60] sm:$0xff]  ;;  %v423_v14 = vld [vmem:[%s1424_s11 + $0x48] sm:$0xff]  ;;  %v421_v18 = vld [vmem:[%s1424_s11 + $0x38] sm:$0xff] }
  0x4f   : > { %1179 = vmatprep.mubr.msk.f32.mxu1 %vm400_vm0, %v410_v8  ;;  %v585_v15 = vld [vmem:[%s1429_s21 + $0x48] sm:$0xff]  ;;  %v422_v16 = vld [vmem:[%s1424_s11 + $0x40] sm:$0xff]  ;;  %v583_v19 = vld [vmem:[%s1429_s21 + $0x38] sm:$0xff] }
  0x50   : > { %1112 = vmatpush3.xpose.msk.msra.mxu0 %vm400_vm0, %v428_v2  ;;  %v584_v17 = vld [vmem:[%s1429_s21 + $0x40] sm:$0xff]  ;;  %v420_v20 = vld [vmem:[%s1424_s11 + $0x30] sm:$0xff]  ;;  %v419_v22 = vld [vmem:[%s1424_s11 + $0x28] sm:$0xff] }
  0x51   : > { %1113 = vmatprep.subr.msk.mxu0 %vm400_vm0, %v427_v5  ;;  %1150 = vmatpush3.xpose.msk.msra.mxu1 %vm400_vm0, %v590_v4  ;;  %v582_v21 = vld [vmem:[%s1429_s21 + $0x30] sm:$0xff]  ;;  %v581_v23 = vld [vmem:[%s1429_s21 + $0x28] sm:$0xff]  ;;  %v418_v24 = vld [vmem:[%s1424_s11 + $0x20] sm:$0xff] }
  0x52   : > { %1151 = vmatprep.subr.msk.mxu1 %vm400_vm0, %v589_v6  ;;  %v580_v25 = vld [vmem:[%s1429_s21 + $0x20] sm:$0xff]  ;;  %v417_v26 = vld [vmem:[%s1424_s11 + $0x18] sm:$0xff]  ;;  %v416_v28 = vld [vmem:[%s1424_s11 + $0x10] sm:$0xff] }
  0x53   : > { %v579_v27 = vld [vmem:[%s1429_s21 + $0x18] sm:$0xff]  ;;  %v578_v29 = vld [vmem:[%s1429_s21 + $0x10] sm:$0xff]  ;;  %v415_v30 = vld [vmem:[%s1424_s11 + $0x8] sm:$0xff] }
  0x54   : > { %1114 = vmatpush3.xpose.msk.msra.mxu0 %vm400_vm0, %v427_v5  ;;  %v577_v31 = vld [vmem:[%s1429_s21 + $0x8] sm:$0xff]  ;;  %v414_v32 = vld [vmem:[%s1424_s11] sm:$0xff]  ;;  %v412_v35 = vld [vmem:[%s1418_s26 + $0x10] sm:$0xff] }
  0x55   : > { %1115 = vmatprep.subr.msk.mxu0 %vm400_vm0, %v426_v7  ;;  %1152 = vmatpush3.xpose.msk.msra.mxu1 %vm400_vm0, %v589_v6  ;;  %v576_v33 = vld [vmem:[%s1429_s21] sm:$0xff]  ;;  %v411_v34 = vld [vmem:[%s1418_s26 + $0x8] sm:$0xff]  ;;  %v413_v36 = vld [vmem:[%s1418_s26 + $0x18] sm:$0xff] }
  0x56   : > { %1153 = vmatprep.subr.msk.mxu1 %vm400_vm0, %v588_v9  ;;  %v768_v37 = vld [vmem:[%s1440_s30 + $0x38] sm:$0xff]  ;;  %v767_v38 = vld [vmem:[%s1440_s30 + $0x30] sm:$0xff]  ;;  %v766_v39 = vld [vmem:[%s1440_s30 + $0x28] sm:$0xff] }
  0x57   : > { %v765_v40 = vld [vmem:[%s1440_s30 + $0x20] sm:$0xff]  ;;  %v764_v41 = vld [vmem:[%s1440_s30 + $0x18] sm:$0xff]  ;;  %v763_v42 = vld [vmem:[%s1440_s30 + $0x10] sm:$0xff] }
  0x58   : > { %1116 = vmatpush3.xpose.msk.msra.mxu0 %vm400_vm0, %v426_v7  ;;  %v762_v43 = vld [vmem:[%s1440_s30 + $0x8] sm:$0xff]  ;;  %v761_v44 = vld [vmem:[%s1440_s30] sm:$0xff] }
  0x59   : > { %1117 = vmatprep.subr.msk.mxu0 %vm400_vm0, %v425_v10  ;;  %1154 = vmatpush3.xpose.msk.msra.mxu1 %vm400_vm0, %v588_v9 }
  0x5a   : > { %1155 = vmatprep.subr.msk.mxu1 %vm400_vm0, %v587_v11 }
  0x5c   : > { %1118 = vmatpush3.xpose.msk.msra.mxu0 %vm400_vm0, %v425_v10 }
  0x5d   : > { %1119 = vmatprep.subr.msk.mxu0 %vm400_vm0, %v424_v12  ;;  %1156 = vmatpush3.xpose.msk.msra.mxu1 %vm400_vm0, %v587_v11 }
  0x5e   : > { %1157 = vmatprep.subr.msk.mxu1 %vm400_vm0, %v586_v13 }
  0x60   : > { %1120 = vmatpush3.xpose.msk.msra.mxu0 %vm400_vm0, %v424_v12 }
  0x61   : > { %1121 = vmatprep.subr.msk.mxu0 %vm400_vm0, %v423_v14  ;;  %1158 = vmatpush3.xpose.msk.msra.mxu1 %vm400_vm0, %v586_v13  ;;  %v758_v13 = vld [vmem:[#allocation2 + $0x8] sm:$0xff] }
  0x62   : > { %1159 = vmatprep.subr.msk.mxu1 %vm400_vm0, %v585_v15 }
  0x64   : > { %1122 = vmatpush3.xpose.msk.msra.mxu0 %vm400_vm0, %v423_v14 }
  0x65   : > { %1123 = vmatprep.subr.msk.mxu0 %vm400_vm0, %v422_v16  ;;  %1160 = vmatpush3.xpose.msk.msra.mxu1 %vm400_vm0, %v585_v15  ;;  %v757_v15 = vld [vmem:[#allocation2] sm:$0xff] }
  0x66   : > { %1161 = vmatprep.subr.msk.mxu1 %vm400_vm0, %v584_v17 }
  0x68   : > { %1124 = vmatpush3.xpose.msk.msra.mxu0 %vm400_vm0, %v422_v16 }
  0x69   : > { %1125 = vmatprep.subr.msk.mxu0 %vm400_vm0, %v421_v18  ;;  %1162 = vmatpush3.xpose.msk.msra.mxu1 %vm400_vm0, %v584_v17 }
  0x6a   : > { %1163 = vmatprep.subr.msk.mxu1 %vm400_vm0, %v583_v19 }
  0x6c   : > { %1126 = vmatpush3.xpose.msk.msra.mxu0 %vm400_vm0, %v421_v18  ;;  %v760_v18 = vld [vmem:[#allocation2 + $0x18] sm:$0xff] }
  0x6d   : > { %1127 = vmatprep.subr.msk.mxu0 %vm400_vm0, %v420_v20  ;;  %1164 = vmatpush3.xpose.msk.msra.mxu1 %vm400_vm0, %v583_v19 }
  0x6e   : > { %1165 = vmatprep.subr.msk.mxu1 %vm400_vm0, %v582_v21 }
  0x70   : > { %1128 = vmatpush3.xpose.msk.msra.mxu0 %vm400_vm0, %v420_v20 }
  0x71   : > { %1129 = vmatprep.subr.msk.mxu0 %vm400_vm0, %v419_v22  ;;  %1166 = vmatpush3.xpose.msk.msra.mxu1 %vm400_vm0, %v582_v21  ;;  %v759_v21 = vld [vmem:[#allocation2 + $0x10] sm:$0xff] }
  0x72   : > { %1167 = vmatprep.subr.msk.mxu1 %vm400_vm0, %v581_v23 }
  0x74   : > { %1130 = vmatpush3.xpose.msk.msra.mxu0 %vm400_vm0, %v419_v22 }
  0x75   : > { %1131 = vmatprep.subr.msk.mxu0 %vm400_vm0, %v418_v24  ;;  %1168 = vmatpush3.xpose.msk.msra.mxu1 %vm400_vm0, %v581_v23 }
  0x76   : > { %1169 = vmatprep.subr.msk.mxu1 %vm400_vm0, %v580_v25 }
  0x78   : > { %1132 = vmatpush3.xpose.msk.msra.mxu0 %vm400_vm0, %v418_v24 }
  0x79   : > { %1133 = vmatprep.subr.msk.mxu0 %vm400_vm0, %v417_v26  ;;  %1170 = vmatpush3.xpose.msk.msra.mxu1 %vm400_vm0, %v580_v25 }
  0x7a   : > { %1171 = vmatprep.subr.msk.mxu1 %vm400_vm0, %v579_v27 }
  0x7c   : > { %1134 = vmatpush3.xpose.msk.msra.mxu0 %vm400_vm0, %v417_v26 }
  0x7d   : > { %1135 = vmatprep.subr.msk.mxu0 %vm400_vm0, %v416_v28  ;;  %1172 = vmatpush3.xpose.msk.msra.mxu1 %vm400_vm0, %v579_v27 }
  0x7e   : > { %1173 = vmatprep.subr.msk.mxu1 %vm400_vm0, %v578_v29 }
  0x80   : > { %1136 = vmatpush3.xpose.msk.msra.mxu0 %vm400_vm0, %v416_v28 }
  0x81   : > { %1137 = vmatprep.subr.msk.mxu0 %vm400_vm0, %v415_v30  ;;  %1174 = vmatpush3.xpose.msk.msra.mxu1 %vm400_vm0, %v578_v29 }
  0x82   : > { %1175 = vmatprep.subr.msk.mxu1 %vm400_vm0, %v577_v31 }
  0x84   : > { %1138 = vmatpush3.xpose.msk.msra.mxu0 %vm400_vm0, %v415_v30 }
  0x85   : > { %1139 = vmatprep.subr.msk.mxu0 %vm400_vm0, %v414_v32  ;;  %1176 = vmatpush3.xpose.msk.msra.mxu1 %vm400_vm0, %v577_v31 }
  0x86   : > { %1177 = vmatprep.subr.msk.mxu1 %vm400_vm0, %v576_v33 }
  0x88   : > { %1140 = vmatpush3.xpose.msk.msra.mxu0 %vm400_vm0, %v414_v32 }
  0x89   : > { %1178 = vmatpush3.xpose.msk.msra.mxu1 %vm400_vm0, %v576_v33  ;;  %1185 = vmatprep.subr.mxu0 %v768_v37 }
  0x8a   : > { %1207 = vmatprep.subr.mxu1 %v768_v37 }
  0x8b   : > { %1142 = vmatmul.mubr.msk.f32.vlgmr.msra.gmra.mxu0 %vm400_vm0, %v411_v34 }
  0x8c   : > { %1144 = vmatprep.mubr.msk.f32.mxu0 %vm400_vm0, %v412_v35  ;;  %1180 = vmatmul.mubr.msk.f32.vlgmr.msra.gmra.mxu1 %vm400_vm0, %v411_v34 }
  0x8d   : > { %1182 = vmatprep.mubr.msk.f32.mxu1 %vm400_vm0, %v412_v35  ;;  %1186 = vmatpush3.xpose.msra.mxu0 %v768_v37 }
  0x8e   : > { %1215 = vmatpush3.xpose.msra.mxu1 %v768_v37  ;;  %1187 = vmatprep.subr.mxu0 %v767_v38 }
  0x8f   : > { %1145 = vmatmul.mubr.msk.f32.gmra.mxu0 %vm400_vm0, %v413_v36  ;;  %1208 = vmatprep.subr.mxu1 %v767_v38 }
  0x90   : > { %1183 = vmatmul.mubr.msk.f32.gmra.mxu1 %vm400_vm0, %v413_v36 }
  0x91   : > { %1188 = vmatpush3.xpose.msra.mxu0 %v767_v38 }
  0x92   : > { %1216 = vmatpush3.xpose.msra.mxu1 %v767_v38  ;;  %1189 = vmatprep.subr.mxu0 %v766_v39 }
  0x93   : > { %1209 = vmatprep.subr.mxu1 %v766_v39 }
  0x95   : > { %1190 = vmatpush3.xpose.msra.mxu0 %v766_v39 }
  0x96   : > { %1217 = vmatpush3.xpose.msra.mxu1 %v766_v39  ;;  %1191 = vmatprep.subr.mxu0 %v765_v40 }
  0x97   : > { %1210 = vmatprep.subr.mxu1 %v765_v40 }
  0x99   : > { %1192 = vmatpush3.xpose.msra.mxu0 %v765_v40 }
  0x9a   : > { %1218 = vmatpush3.xpose.msra.mxu1 %v765_v40  ;;  %1193 = vmatprep.subr.mxu0 %v764_v41 }
  0x9b   : > { %1211 = vmatprep.subr.mxu1 %v764_v41 }
  0x9d   : > { %1194 = vmatpush3.xpose.msra.mxu0 %v764_v41 }
  0x9e   : > { %1219 = vmatpush3.xpose.msra.mxu1 %v764_v41  ;;  %1195 = vmatprep.subr.mxu0 %v763_v42 }
  0x9f   : > { %1212 = vmatprep.subr.mxu1 %v763_v42 }
  0xa1   : > { %1196 = vmatpush3.xpose.msra.mxu0 %v763_v42 }
  0xa2   : > { %1220 = vmatpush3.xpose.msra.mxu1 %v763_v42  ;;  %1197 = vmatprep.subr.mxu0 %v762_v43 }
  0xa3   : > { %1213 = vmatprep.subr.mxu1 %v762_v43 }
  0xa5   : > { %1198 = vmatpush3.xpose.msra.mxu0 %v762_v43 }
  0xa6   : > { %1221 = vmatpush3.xpose.msra.mxu1 %v762_v43  ;;  %1199 = vmatprep.subr.mxu0 %v761_v44 }
  0xa7   : > { %1214 = vmatprep.subr.mxu1 %v761_v44 }
  0xa9   : > { %1200 = vmatpush3.xpose.msra.mxu0 %v761_v44 }
  0xaa   : > { %1222 = vmatpush3.xpose.msra.mxu1 %v761_v44 }
 0x14b   : > { %v1143_v45 = vpop.f32.mrf.mxu0 }
 0x14c   : > { %v1052_v46 = vmul.f32 -1.442695, %v1143_v45  ;;  %v1181_v61 = vpop.f32.mrf.mxu1 }
 0x14d   : > { %v557_v47 = vpop.f32.mrf.mxu0 }
 0x14e   : > { %1251 = vpow2.f32 %v1052_v46  ;;  %v1051_v48 = vmul.f32 -1.442695, %v557_v47  ;;  %v706_v63 = vpop.f32.mrf.mxu1 }
 0x14f   : > { %v1146_v49 = vpop.f32.mrf.mxu0 }
 0x150   : > { %1253 = vpow2.f32 %v1051_v48  ;;  %v1054_v50 = vmul.f32 -1.442695, %v1146_v49  ;;  %v1184_v4 = vpop.f32.mrf.mxu1 }
 0x151   : > { %v567_v51 = vpop.f32.mrf.mxu0 }
 0x152   : > { %1255 = vpow2.f32 %v1054_v50  ;;  %v1053_v52 = vmul.f32 -1.442695, %v567_v51  ;;  %v716_v10 = vpop.f32.mrf.mxu1 }
 0x154   : > { %1257 = vpow2.f32 %v1053_v52 }
 0x15b   : > { %v1252_v53 = vpop.eup %1251 }
 0x15c   : > { %v738_v54 = vadd.f32 1.0, %v1252_v53 }
 0x15d   : > { %v1254_v55 = vpop.eup %1253 }
 0x15e   : > { %1259 = vrcp.f32 %v738_v54  ;;  %v737_v56 = vadd.f32 1.0, %v1254_v55 }
 0x15f   : > { %v1256_v57 = vpop.eup %1255 }
 0x160   : > { %1261 = vrcp.f32 %v737_v56  ;;  %v740_v58 = vadd.f32 1.0, %v1256_v57 }
 0x161   : > { %v1258_v59 = vpop.eup %1257 }
 0x162   : > { %1263 = vrcp.f32 %v740_v58  ;;  %v739_v60 = vadd.f32 1.0, %v1258_v59 }
 0x164   : > { %1265 = vrcp.f32 %v739_v60 }
 0x16b   : > { %v1260_v62 = vpop.eup %1259 }
 0x16c   : > { %v750_v1 = vmul.f32 %v1260_v62, %v1143_v45 }
 0x16d   : > { %v1262_v0 = vpop.eup %1261 }
 0x16e   : > { %v749_v2 = vmul.f32 %v1262_v0, %v557_v47  ;;  %v754_v8 = vmul.f32 %v1181_v61, %v750_v1 }
 0x16f   : > { %v1264_v3 = vpop.eup %1263 }
 0x170   : > { %v753_v5 = vmul.f32 %v749_v2, %v706_v63  ;;  %v752_v7 = vmul.f32 %v1264_v3, %v1146_v49 }
 0x171   : > { %v1266_v6 = vpop.eup %1265 }
 0x172   : > { %v751_v9 = vmul.f32 %v1266_v6, %v567_v51  ;;  %1201 = vmatprep.mubr.f32.mxu0 %v753_v5  ;;  %v756_v12 = vmul.f32 %v1184_v4, %v752_v7 }
 0x173   : > { %1202 = vmatmul.mubr.f32.vlgmr.msra.gmra.mxu0 %v754_v8 }
 0x174   : > { %v755_v11 = vmul.f32 %v751_v9, %v716_v10 }
 0x176   : > { %1204 = vmatprep.mubr.f32.mxu1 %v755_v11 }
 0x177   : > { %1205 = vmatmul.mubr.f32.vlgmr.msra.gmra.mxu1 %v756_v12 }
 0x233   : > { %v1203_v14 = vpop.f32.mrf.mxu0 }
 0x234   : > { %v855_v16 = vadd.f32 %v1203_v14, %v758_v13 }
 0x235   : > { %v835_v17 = vpop.f32.mrf.mxu0 }
 0x236   : > { %859 = vst.msk [vmem:[#allocation2 + $0x8] sm:$0xff] %vm400_vm0, %v855_v16  ;;  %v854_v19 = vadd.f32 %v835_v17, %v757_v15 }
 0x237   : > { %v1206_v20 = vpop.f32.mrf.mxu1 }
 0x238   : > { %858 = vst.msk [vmem:[#allocation2] sm:$0xff] %vm400_vm0, %v854_v19  ;;  %v857_v22 = vadd.f32 %v1206_v20, %v760_v18 }
 0x239   : > { %v845_v23 = vpop.f32.mrf.mxu1 }
 0x23a   : > { %861 = vst.msk [vmem:[#allocation2 + $0x18] sm:$0xff] %vm400_vm0, %v857_v22  ;;  %v856_v24 = vadd.f32 %v845_v23, %v759_v21 }
 0x23c   : > { %860 = vst.msk [vmem:[#allocation2 + $0x10] sm:$0xff] %vm400_vm0, %v856_v24 }
 0x23d PF: > { %v866_v26 = vld [vmem:[#allocation2 + $0x8] sm:$0xff] }
 0x23e   : > { %871 = vst.msk [vmem:[%s1434_s20 + $0x8] sm:$0xff] %vm400_vm0, %v866_v26 }
 0x23f   : > { %v865_v25 = vld [vmem:[#allocation2] sm:$0xff] }
 0x240   : > { %870 = vst.msk [vmem:[%s1434_s20] sm:$0xff] %vm400_vm0, %v865_v25 }
 0x241   : > { %v868_v28 = vld [vmem:[#allocation2 + $0x18] sm:$0xff] }
 0x242   : > { %873 = vst.msk [vmem:[%s1434_s20 + $0x18] sm:$0xff] %vm400_vm0, %v868_v28 }
 0x243   : > { %v867_v27 = vld [vmem:[#allocation2 + $0x10] sm:$0xff] }
 0x244   : > { %872 = vst.msk [vmem:[%s1434_s20 + $0x10] sm:$0xff] %vm400_vm0, %v867_v27 }
 0x245 PF: > { %s31_s16 = sadd.s32 1, %s1327_s16   ;;  %s1587_s14 = smov %s1323_s15 }
 0x246   : > { %p28_p13 = scmp.ge.s32.totalorder %s31_s16, 11   ;;  %s1588_s15 = smov %s1590_s2 }
 0x248   :  { %30 = sbr.rel (!%p28_p13) target bundleno = 37 (0x25), region = 87 }

</bundles_post_ra>
